<compile_context>
chip_gen: v5e
topology: v5e:2x2
jax: 0.10.0
libtpu: 0.0.40
codegen_flags: <defaults>
</compile_context>

<pallas_src>
import functools
import math

import jax
import jax.numpy as jnp
from jax.experimental import pallas as pl
from jax.experimental.pallas import tpu as pltpu


def _lconv_kernel(x_ref, w_ref, o_ref, *scratch, K, dilation, padding, T, T_dense,
                  use_staging):
    """One grid step = one (batch, channel-tile) block.

    x_ref  : (1, C_TILE, T)        unpadded input tile (VMEM)
    w_ref  : (C_TILE, K)           per-channel taps, already softmaxed, f32
    o_ref  : (1, C_TILE, T_dense)  dense (stride=1) output tile
    scratch: optional (C_TILE, T + 2*padding) f32 staging buffer (sub-32-bit inputs or
             degenerate short-sequence fallback)
    """
    w = w_ref[...]                                    # (C_TILE, K), f32
    c_tile = o_ref.shape[1]
    d = dilation
    P = padding

    if use_staging:
        # One pass: upcast to f32 (and fold in the zero halo if padding > 0).
        xs_ref = scratch[0]                           # (C_TILE, T + 2P), f32
        if P > 0:
            zeros_halo = jnp.zeros((c_tile, P), jnp.float32)
            xs_ref[:, :P] = zeros_halo
            xs_ref[:, T + P:] = zeros_halo
        xs_ref[:, P:P + T] = x_ref[0].astype(jnp.float32)
        acc = w[:, 0:1] * xs_ref[:, 0:T_dense]        # init with tap 0 (no zeros pass)
        for k in range(1, K):
            acc = acc + w[:, k:k + 1] * xs_ref[:, k * d:k * d + T_dense]
        o_ref[0] = acc.astype(o_ref.dtype)
        return

    # ---- f32 input: no staging copy, slice straight from the input ref ----
    if P == 0:
        acc = w[:, 0:1] * x_ref[0, :, 0:T_dense]
        for k in range(1, K):
            acc = acc + w[:, k:k + 1] * x_ref[0, :, k * d:k * d + T_dense]
        o_ref[0] = acc.astype(o_ref.dtype)
        return

    # padding > 0: interior columns need no zero halo, only `P` columns at each end do.
    L = T - d * (K - 1)                               # interior length (>= 1 on this path)
    halo = d * (K - 1)

    # Interior: out[t], t in [P, P+L)  ->  out = sum_k w[k] * x[(t-P) + k*d]
    acc = w[:, 0:1] * x_ref[0, :, 0:L]
    for k in range(1, K):
        acc = acc + w[:, k:k + 1] * x_ref[0, :, k * d:k * d + L]
    o_ref[0, :, P:P + L] = acc.astype(o_ref.dtype)

    zcol = jnp.zeros((c_tile, P), jnp.float32)

    # Left boundary: out[t], t in [0, P).  Tiny (C_TILE, P + halo) edge block.
    if halo > 0:
        xl = jnp.concatenate([zcol, x_ref[0, :, 0:halo]], axis=-1)
    else:
        xl = zcol
    accl = w[:, 0:1] * xl[:, 0:P]
    for k in range(1, K):
        accl = accl + w[:, k:k + 1] * xl[:, k * d:k * d + P]
    o_ref[0, :, 0:P] = accl.astype(o_ref.dtype)

    # Right boundary: out[t], t in [T_dense - P, T_dense).
    if halo > 0:
        xr = jnp.concatenate([x_ref[0, :, L:T], zcol], axis=-1)
    else:
        xr = zcol
    accr = w[:, 0:1] * xr[:, 0:P]
    for k in range(1, K):
        accr = accr + w[:, k:k + 1] * xr[:, k * d:k * d + P]
    o_ref[0, :, P + L:T_dense] = accr.astype(o_ref.dtype)


def _vmem_budgets():
    """Generation-aware (per-step working-set budget, vmem_limit_bytes)."""
    cap = None
    try:
        info = pltpu.get_tpu_info()
        cap = getattr(info, "vmem_capacity_bytes", None)
    except Exception:
        cap = None
    if cap is None:
        cap = 64 * 1024 * 1024                        # conservative (v7x per-TC)
    if cap >= 96 * 1024 * 1024:                       # v5e / v6e: 128 MiB physical
        return 20 * 1024 * 1024, 64 * 1024 * 1024
    return 12 * 1024 * 1024, 40 * 1024 * 1024         # v7x: 64 MiB per TensorCore


def _choose_c_tile(C, T, T_pad, T_dense, x_dtype, use_staging, budget):
    """Largest channel tile whose per-step working set fits `budget` bytes."""
    itemsize = jnp.dtype(x_dtype).itemsize
    # double-buffered input + output blocks, f32 accumulator + one transient slice,
    # plus the f32 staging buffer when used.
    row_bytes = (2 * T + 2 * T_dense) * itemsize + 2 * T_dense * 4
    if use_staging:
        row_bytes += T_pad * 4
    pack = 8 * max(1, 4 // itemsize)                  # 8 f32 / 16 bf16 / 32 int8-fp8
    rows = int(budget // max(row_bytes, 1))
    if rows >= C or C <= pack:
        return C                                      # full-C block is always layout-legal
    return max(pack, (rows // pack) * pack)


def lightweight_conv1d(x, weight, *, stride=1, dilation=1, padding=0,
                       num_heads=1, weight_softmax=True):
    """x: (B, C, T), weight: (num_heads, 1, K). Returns (B, C, T_out)."""
    B, C, T = x.shape
    H, _, K = weight.shape
    assert C % H == 0, "C must be divisible by num_heads"
    assert H == num_heads
    T_pad = T + 2 * padding
    T_dense = T_pad - dilation * (K - 1)              # stride-1 (dense) output length
    assert T_dense >= 1, "kernel does not fit in the (padded) sequence"

    # Grid-invariant weight prep, hoisted out of the kernel:
    # softmax over taps, head -> channel gather (channel c uses head c % H), f32 cast.
    w = weight[:, 0, :].astype(jnp.float32)           # (H, K)
    if weight_softmax:
        w = jax.nn.softmax(w, axis=-1)
    w_ch = w[jnp.arange(C) % H]                       # (C, K) f32

    interior_len = T - dilation * (K - 1)
    # Stage through an f32 VMEM buffer only when we must: sub-32-bit input (cast once,
    # fold the halo in), or the degenerate case where the taps span the whole sequence.
    use_staging = (jnp.dtype(x.dtype) != jnp.dtype(jnp.float32)) or \
                  (padding > 0 and interior_len < 1)

    budget, vmem_limit = _vmem_budgets()
    c_tile = _choose_c_tile(C, T, T_pad, T_dense, x.dtype, use_staging, budget)
    n_ct = pl.cdiv(C, c_tile)

    kernel = functools.partial(_lconv_kernel, K=K, dilation=dilation, padding=padding,
                               T=T, T_dense=T_dense, use_staging=use_staging)
    scratch_shapes = ([pltpu.VMEM((c_tile, T_pad), jnp.float32)] if use_staging else [])

    dense = pl.pallas_call(
        kernel,
        out_shape=jax.ShapeDtypeStruct((B, C, T_dense), x.dtype),
        grid_spec=pltpu.PrefetchScalarGridSpec(
            num_scalar_prefetch=0,
            grid=(B, n_ct),
            in_specs=[
                # last dim equals the full array dim -> no (8,128) issue; C tile is a
                # packing-aligned multiple (or the full C), last C tile may be partial.
                pl.BlockSpec((1, c_tile, T), lambda b, c: (b, c, 0)),
                pl.BlockSpec((c_tile, K), lambda b, c: (c, 0)),
            ],
            out_specs=pl.BlockSpec((1, c_tile, T_dense), lambda b, c: (b, c, 0)),
            scratch_shapes=scratch_shapes,
        ),
        compiler_params=pltpu.CompilerParams(
            dimension_semantics=("parallel", "parallel"),
            vmem_limit_bytes=vmem_limit),
    )(x, w_ch)

    if stride > 1:
        # TODO(synk): subsample inside the kernel (write only T_out columns) to avoid the
        # dense HBM writeback when stride > 1; module default is stride=1 so rarely hit.
        dense = dense[:, :, ::stride]
    return dense


def _reference(x, weight, *, stride, dilation, padding, num_heads, weight_softmax):
    """Plain-JAX reference of the PyTorch forward for a sanity check."""
    B, C, T = x.shape
    H, _, K = weight.shape
    w = jax.nn.softmax(weight.astype(jnp.float32), axis=-1) if weight_softmax \
        else weight.astype(jnp.float32)
    x_pad = jnp.pad(x, ((0, 0), (0, 0), (padding, padding)))
    T_padded = T + 2 * padding
    T_out = (T_padded - dilation * (K - 1) - 1) // stride + 1
    w_ch = w[:, 0, :][jnp.arange(C) % H]              # (C, K)
    out = jnp.zeros((B, C, T_out), jnp.float32)
    for k in range(K):
        s = k * dilation
        xs = x_pad[:, :, s:s + (T_out - 1) * stride + 1:stride]
        out = out + w_ch[None, :, k:k + 1] * xs.astype(jnp.float32)
    return out.astype(x.dtype)


def _xavier_uniform(key, num_heads, kernel_size):
    # Deterministic xavier_uniform_ for weight of shape (num_heads, 1, kernel_size).
    fan_in = 1 * kernel_size
    fan_out = num_heads * kernel_size
    bound = math.sqrt(6.0 / (fan_in + fan_out))
    return jax.random.uniform(key, (num_heads, 1, kernel_size),
                              dtype=jnp.float32, minval=-bound, maxval=bound)


if __name__ == "__main__":
    key = jax.random.PRNGKey(0)

    # Config 1: module-like defaults with "same" padding, f32 (interior + boundary path).
    B, C, T = 2, 4, 16
    num_heads, kernel_size, padding, stride, dilation = 2, 3, 1, 1, 1
    kx, kw, key = jax.random.split(key, 3)
    x = jax.random.normal(kx, (B, C, T), dtype=jnp.float32)
    weight = _xavier_uniform(kw, num_heads, kernel_size)
    out = lightweight_conv1d(x, weight, stride=stride, dilation=dilation,
                             padding=padding, num_heads=num_heads, weight_softmax=True)
    out = jax.block_until_ready(out)
    ref = _reference(x, weight, stride=stride, dilation=dilation,
                     padding=padding, num_heads=num_heads, weight_softmax=True)
    assert out.shape == (B, C, T)                     # padding=1, K=3, stride=1 -> T_out == T
    assert jnp.allclose(out, ref, atol=1e-5, rtol=1e-5)

    # Config 2: no padding, dilation=2, stride=2, f32 (direct-slice path + wrapper subsample).
    B2, C2, T2 = 2, 8, 16
    num_heads2, kernel_size2, padding2, stride2, dilation2 = 2, 3, 0, 2, 2
    kx2, kw2, key = jax.random.split(key, 3)
    x2 = jax.random.normal(kx2, (B2, C2, T2), dtype=jnp.float32)
    weight2 = _xavier_uniform(kw2, num_heads2, kernel_size2)
    out2 = lightweight_conv1d(x2, weight2, stride=stride2, dilation=dilation2,
                              padding=padding2, num_heads=num_heads2, weight_softmax=True)
    out2 = jax.block_until_ready(out2)
    ref2 = _reference(x2, weight2, stride=stride2, dilation=dilation2,
                      padding=padding2, num_heads=num_heads2, weight_softmax=True)
    assert out2.shape == ref2.shape
    assert jnp.allclose(out2, ref2, atol=1e-5, rtol=1e-5)

    # Config 3: bf16 input with padding (one-time f32 upcast folded into the halo staging).
    B3, C3, T3 = 2, 16, 32
    num_heads3, kernel_size3, padding3, stride3, dilation3 = 4, 5, 2, 1, 1
    kx3, kw3, key = jax.random.split(key, 3)
    x3 = jax.random.normal(kx3, (B3, C3, T3), dtype=jnp.float32).astype(jnp.bfloat16)
    weight3 = _xavier_uniform(kw3, num_heads3, kernel_size3)
    out3 = lightweight_conv1d(x3, weight3, stride=stride3, dilation=dilation3,
                              padding=padding3, num_heads=num_heads3, weight_softmax=True)
    out3 = jax.block_until_ready(out3)
    ref3 = _reference(x3, weight3, stride=stride3, dilation=dilation3,
                      padding=padding3, num_heads=num_heads3, weight_softmax=True)
    assert out3.shape == (B3, C3, T3)
    assert jnp.allclose(out3.astype(jnp.float32), ref3.astype(jnp.float32),
                        atol=2e-2, rtol=2e-2)

    print("KERNEL_OK")
</pallas_src>

<mosaic_0001>
module attributes {stable_mosaic.version = 11 : i64} {
  func.func @_lconv_kernel(%arg0: i32, %arg1: i32, %arg2: memref<1x4x16xf32, #tpu.memory_space<vmem>>, %arg3: memref<4x3xf32, #tpu.memory_space<vmem>>, %arg4: memref<1x4x16xf32, #tpu.memory_space<vmem>>) attributes {dimension_semantics = [#tpu.dimension_semantics<parallel>, #tpu.dimension_semantics<parallel>], iteration_bounds = array<i64: 2, 1>, scalar_prefetch = 0 : i64, scratch_operands = 0 : i64, tpu.core_type = #tpu.core_type<tc>, window_params = [{transform_indices = @transform_0, window_bounds = array<i64: 1, 4, 16>}, {transform_indices = @transform_1, window_bounds = array<i64: 4, 3>}, {transform_indices = @transform_2, window_bounds = array<i64: 1, 4, 16>}]} {
    %c0 = arith.constant 0 : index
    %c0_0 = arith.constant 0 : index
    %0 = vector.load %arg3[%c0, %c0_0] : memref<4x3xf32, #tpu.memory_space<vmem>>, vector<4x3xf32>
    %1 = vector.extract_strided_slice %0 {offsets = [0, 0], sizes = [4, 1], strides = [1, 1]} : vector<4x3xf32> to vector<4x1xf32>
    %c0_1 = arith.constant 0 : index
    %c0_2 = arith.constant 0 : index
    %c0_3 = arith.constant 0 : index
    %2 = vector.load %arg2[%c0_1, %c0_2, %c0_3] : memref<1x4x16xf32, #tpu.memory_space<vmem>>, vector<1x4x14xf32>
    %3 = vector.shape_cast %2 : vector<1x4x14xf32> to vector<4x14xf32>
    %4 = vector.broadcast %1 : vector<4x1xf32> to vector<4x14xf32>
    %5 = arith.mulf %4, %3 : vector<4x14xf32>
    %6 = vector.extract_strided_slice %0 {offsets = [0, 1], sizes = [4, 1], strides = [1, 1]} : vector<4x3xf32> to vector<4x1xf32>
    %c0_4 = arith.constant 0 : index
    %c0_5 = arith.constant 0 : index
    %c1 = arith.constant 1 : index
    %7 = vector.load %arg2[%c0_4, %c0_5, %c1] : memref<1x4x16xf32, #tpu.memory_space<vmem>>, vector<1x4x14xf32>
    %8 = vector.shape_cast %7 : vector<1x4x14xf32> to vector<4x14xf32>
    %9 = vector.broadcast %6 : vector<4x1xf32> to vector<4x14xf32>
    %10 = arith.mulf %9, %8 : vector<4x14xf32>
    %11 = arith.addf %5, %10 : vector<4x14xf32>
    %12 = vector.extract_strided_slice %0 {offsets = [0, 2], sizes = [4, 1], strides = [1, 1]} : vector<4x3xf32> to vector<4x1xf32>
    %c0_6 = arith.constant 0 : index
    %c0_7 = arith.constant 0 : index
    %c2 = arith.constant 2 : index
    %13 = vector.load %arg2[%c0_6, %c0_7, %c2] : memref<1x4x16xf32, #tpu.memory_space<vmem>>, vector<1x4x14xf32>
    %14 = vector.shape_cast %13 : vector<1x4x14xf32> to vector<4x14xf32>
    %15 = vector.broadcast %12 : vector<4x1xf32> to vector<4x14xf32>
    %16 = arith.mulf %15, %14 : vector<4x14xf32>
    %17 = arith.addf %11, %16 : vector<4x14xf32>
    %c0_8 = arith.constant 0 : index
    %c0_9 = arith.constant 0 : index
    %c1_10 = arith.constant 1 : index
    %18 = vector.load %arg4[%c0_8, %c0_9, %c1_10] : memref<1x4x16xf32, #tpu.memory_space<vmem>>, vector<1x4x14xf32>
    %19 = vector.shape_cast %18 : vector<1x4x14xf32> to vector<4x14xf32>
    %20 = vector.shape_cast %17 : vector<4x14xf32> to vector<1x4x14xf32>
    tpu.vector_store %arg4[%c0_8, %c0_9, %c1_10], %20 {strides = array<i32>} : memref<1x4x16xf32, #tpu.memory_space<vmem>>, vector<1x4x14xf32>,
    %cst = arith.constant 0.000000e+00 : f32
    %21 = vector.broadcast %cst : f32 to vector<4x1xf32>
    %c0_11 = arith.constant 0 : index
    %c0_12 = arith.constant 0 : index
    %c0_13 = arith.constant 0 : index
    %22 = vector.load %arg2[%c0_11, %c0_12, %c0_13] : memref<1x4x16xf32, #tpu.memory_space<vmem>>, vector<1x4x2xf32>
    %23 = vector.shape_cast %22 : vector<1x4x2xf32> to vector<4x2xf32>
    %24 = tpu.concatenate %21, %23 in 1 : vector<4x1xf32>, vector<4x2xf32> -> vector<4x3xf32>
    %25 = vector.extract_strided_slice %0 {offsets = [0, 0], sizes = [4, 1], strides = [1, 1]} : vector<4x3xf32> to vector<4x1xf32>
    %26 = vector.extract_strided_slice %24 {offsets = [0, 0], sizes = [4, 1], strides = [1, 1]} : vector<4x3xf32> to vector<4x1xf32>
    %27 = arith.mulf %25, %26 : vector<4x1xf32>
    %28 = vector.extract_strided_slice %0 {offsets = [0, 1], sizes = [4, 1], strides = [1, 1]} : vector<4x3xf32> to vector<4x1xf32>
    %29 = vector.extract_strided_slice %24 {offsets = [0, 1], sizes = [4, 1], strides = [1, 1]} : vector<4x3xf32> to vector<4x1xf32>
    %30 = arith.mulf %28, %29 : vector<4x1xf32>
    %31 = arith.addf %27, %30 : vector<4x1xf32>
    %32 = vector.extract_strided_slice %0 {offsets = [0, 2], sizes = [4, 1], strides = [1, 1]} : vector<4x3xf32> to vector<4x1xf32>
    %33 = vector.extract_strided_slice %24 {offsets = [0, 2], sizes = [4, 1], strides = [1, 1]} : vector<4x3xf32> to vector<4x1xf32>
    %34 = arith.mulf %32, %33 : vector<4x1xf32>
    %35 = arith.addf %31, %34 : vector<4x1xf32>
    %c0_14 = arith.constant 0 : index
    %c0_15 = arith.constant 0 : index
    %c0_16 = arith.constant 0 : index
    %36 = vector.load %arg4[%c0_14, %c0_15, %c0_16] : memref<1x4x16xf32, #tpu.memory_space<vmem>>, vector<1x4x1xf32>
    %37 = vector.shape_cast %36 : vector<1x4x1xf32> to vector<4x1xf32>
    %38 = vector.shape_cast %35 : vector<4x1xf32> to vector<1x4x1xf32>
    tpu.vector_store %arg4[%c0_14, %c0_15, %c0_16], %38 {strides = array<i32>} : memref<1x4x16xf32, #tpu.memory_space<vmem>>, vector<1x4x1xf32>,
    %c0_17 = arith.constant 0 : index
    %c0_18 = arith.constant 0 : index
    %c14 = arith.constant 14 : index
    %39 = vector.load %arg2[%c0_17, %c0_18, %c14] : memref<1x4x16xf32, #tpu.memory_space<vmem>>, vector<1x4x2xf32>
    %40 = vector.shape_cast %39 : vector<1x4x2xf32> to vector<4x2xf32>
    %41 = tpu.concatenate %40, %21 in 1 : vector<4x2xf32>, vector<4x1xf32> -> vector<4x3xf32>
    %42 = vector.extract_strided_slice %0 {offsets = [0, 0], sizes = [4, 1], strides = [1, 1]} : vector<4x3xf32> to vector<4x1xf32>
    %43 = vector.extract_strided_slice %41 {offsets = [0, 0], sizes = [4, 1], strides = [1, 1]} : vector<4x3xf32> to vector<4x1xf32>
    %44 = arith.mulf %42, %43 : vector<4x1xf32>
    %45 = vector.extract_strided_slice %0 {offsets = [0, 1], sizes = [4, 1], strides = [1, 1]} : vector<4x3xf32> to vector<4x1xf32>
    %46 = vector.extract_strided_slice %41 {offsets = [0, 1], sizes = [4, 1], strides = [1, 1]} : vector<4x3xf32> to vector<4x1xf32>
    %47 = arith.mulf %45, %46 : vector<4x1xf32>
    %48 = arith.addf %44, %47 : vector<4x1xf32>
    %49 = vector.extract_strided_slice %0 {offsets = [0, 2], sizes = [4, 1], strides = [1, 1]} : vector<4x3xf32> to vector<4x1xf32>
    %50 = vector.extract_strided_slice %41 {offsets = [0, 2], sizes = [4, 1], strides = [1, 1]} : vector<4x3xf32> to vector<4x1xf32>
    %51 = arith.mulf %49, %50 : vector<4x1xf32>
    %52 = arith.addf %48, %51 : vector<4x1xf32>
    %c0_19 = arith.constant 0 : index
    %c0_20 = arith.constant 0 : index
    %c15 = arith.constant 15 : index
    %53 = vector.load %arg4[%c0_19, %c0_20, %c15] : memref<1x4x16xf32, #tpu.memory_space<vmem>>, vector<1x4x1xf32>
    %54 = vector.shape_cast %53 : vector<1x4x1xf32> to vector<4x1xf32>
    %55 = vector.shape_cast %52 : vector<4x1xf32> to vector<1x4x1xf32>
    tpu.vector_store %arg4[%c0_19, %c0_20, %c15], %55 {strides = array<i32>} : memref<1x4x16xf32, #tpu.memory_space<vmem>>, vector<1x4x1xf32>,
    return
  }
  func.func @transform_0(%arg0: i32, %arg1: i32) -> (i32, i32, i32) {
    %c0_i32 = arith.constant 0 : i32
    %c0_i32_0 = arith.constant 0 : i32
    return %arg0, %arg1, %c0_i32 : i32, i32, i32
  }
  func.func @transform_1(%arg0: i32, %arg1: i32) -> (i32, i32) {
    %c0_i32 = arith.constant 0 : i32
    %c0_i32_0 = arith.constant 0 : i32
    return %arg1, %c0_i32 : i32, i32
  }
  func.func @transform_2(%arg0: i32, %arg1: i32) -> (i32, i32, i32) {
    %c0_i32 = arith.constant 0 : i32
    %c0_i32_0 = arith.constant 0 : i32
    return %arg0, %arg1, %c0_i32 : i32, i32, i32
  }
}

</mosaic_0001>

<bundles_post_ra>
// kernel: tpu_custom_call.1
= control target key start
LH: loop header
LB: loop body
LE: loop exit
PB: predicated region body
PF: predicated region fallthrough
CT: control target
= control target key end

     0   :  { %7 = vsyncpa [#allocation3], 0  ;;  %s812_s0 = inlined_call_operand.hbm [shape: f32[2,4,16], index: 0, kind: input, shape index: {}]   ;;  %s813_s1 = inlined_call_operand.hbm [shape: f32[4,3], index: 1, kind: input, shape index: {}]   ;;  %s814_s2 = inlined_call_operand.hbm [shape: f32[2,4,16], index: 2, kind: output, shape index: {}]  }
   0x1   :  { %9 = vsyncpa [#allocation3 + $0x1], 0 }
   0x2   :  { %10 = vsyncpa [#allocation6], 0 }
   0x3   :  { %11 = vsyncpa [#allocation4], 0 }
   0x4   :  { %13 = vsyncpa [#allocation4 + $0x1], 0  ;;  %s657_s9 = smov 0   ;;  %s659_s10 = smov 0  }
   0x5   :  { %s661_s11 = smov 0   ;;  %s663_s12 = smov 0  }
   0x6   :  { %s665_s13 = smov 0   ;;  %s667_s14 = smov 0  }
   0x7 LB: > { %s385_s15 = sadd.s32 4294967295, %s631_s14   ;;  %s386_s16 = sadd.s32 4294967294, %s631_s14   ;;  %s631_s14 = sphi %s667_s14, %s19_s14   ;;  %s627_s13 = sphi %s665_s13, %s826_s13   ;;  %s623_s12 = sphi %s663_s12, %s825_s12   ;;  %s619_s11 = sphi %s661_s11, %s824_s11   ;;  %s615_s10 = sphi %s659_s10, %s823_s10   ;;  %s611_s9 = sphi %s657_s9, %s822_s9  }
   0x8   : > { %p53_p0 = scmp.ne.s32.totalorder %s615_s10, %s611_s9  ;;  %p691_p1 = scmp.eq.s32.totalorder %s385_s15, 0 }
   0x9   : > { %p695_p2 = scmp.eq.s32.totalorder %s385_s15, 1  ;;  %p111_p3 = scmp.eq.s32.totalorder %s386_s16, 1 }
   0xa   : > { %p701_p4 = por %p691_p1, %p53_p0  ;;  %p387_p5 = scmp.ge.s32.totalorder %s631_s14, 1 }
   0xb   : > { %p706_p6 = por %p111_p3, %p53_p0  ;;  %p118_p7 = scmp.lt.s32.totalorder %s631_s14, 3 }
   0xc   : > { %s132_s23 = sshll.u32 %s813_s1, 4  ;;  %p389_p9 = scmp.ge.s32.totalorder %s631_s14, 2  ;;  %s133_s23 = int_to_ptr.hbm [resolvable:$true] %s132_s23 }
   0xd   : > { %p714_p8 = pnand %p387_p5, %p118_p7  ;;  %s633_s25 = smov [#allocation5]  }
   0xe   : > { %s134_s26 = sshll.u32 %s633_s25, 4  ;;  %s31_s27 = sadd.s32 1, %s627_s13  ;;  %s135_s26 = int_to_ptr.vmem [resolvable:$true] %s134_s26 }
   0xf   : > { %p408_p10 = pneg %p714_p8  ;;  %p33_p12 = scmp.ge.s32.totalorder %s31_s27, 2 }
  0x10   : > { %s40_s28 = sadd.s32 1, %s619_s11  ;;  %p47_p13 = scmp.ne.s32.totalorder %s619_s11, %s615_s10 }
  0x11   : > { %p409_p11 = pnand %p408_p10, %p691_p1  ;;  %p48_p0 = scmp.eq.s32.totalorder %s631_s14, 0 }
  0x12   : > { %s828_s27 = smov (%p33_p12, %s31_s27), 0  ;;  %p736_p5 = por %p695_p2, %p47_p13 }
  0x13   : > { %411 = dma.hbm_to_vmem [thread:$0]  (!%p409_p11), %s133_s23, 64, %s135_s26, [#allocation6]  }
  0x14   : > { %p730_p3 = por %p48_p0, %p47_p13  ;;  %s35_s3 = ssub.s32 %s627_s13, %s828_s27 }
  0x15   : > { %p421_p7 = scmp.lt.s32.totalorder %s631_s14, 2  ;;  %p38_p10 = scmp.eq.s32.totalorder %s35_s3, 0 }
  0x16   : > { %s145_s4 = sand.u32 1, %s619_s11   ;;  %s391_s7 = sshll.u32 %s627_s13, 2 }
  0x17   : > { %s390_s5 = sshll.u32 %s145_s4, 2  ;;  %s154_s16 = scalar_lea.hbm %s812_s0, %s391_s7 }
  0x18   : > { %s745_s6 = scalar_select %p38_p10, %s619_s11, %s40_s28  }
  0x19   : > { %s149_s21 = scalar_lea.vmem [#allocation2], %s390_s5  ;;  %s156_s18 = sshll.u32 %s154_s16, 4  ;;  %s157_s18 = int_to_ptr.hbm [resolvable:$true] %s156_s18 }
  0x1a   : > { %s158_s22 = sshll.u32 %s149_s21, 4  ;;  %p413_p2 = pnand %p421_p7, %p730_p3  ;;  %s159_s22 = int_to_ptr.vmem [resolvable:$true] %s158_s22 }
  0x1b   : > { %s146_s23 = scalar_lea.sflag [#allocation3], %s145_s4  ;;  %167 = sbr.rel (%p714_p8) target bundleno = 400 (0x190), region = 28 }
  0x1c   : > { %415 = dma.hbm_to_vmem [thread:$0]  (!%p413_p2), %s157_s18, 64, %s159_s22, %s146_s23  }
  0x1d   : > { %s756_s25 = sand.u32 (!%p714_p8), 1, %s615_s10  }
  0x1e   : > { %s393_s26 = sshll.u32 (!%p714_p8), %s756_s25, 2  ;;  %s170_s28 = scalar_lea.sflag (!%p714_p8), [#allocation3], %s756_s25 }
  0x1f   : > { %s173_s3 = scalar_lea.vmem (!%p714_p8), [#allocation2], %s393_s26 }
  0x20   : > { %598 = dma.done.wait (%p701_p4), %s170_s28, 64  }
  0x21   : > { %600 = vsyncadd (%p701_p4), %s170_s28, 4294967232 }
  0x22   : > { %602 = dma.done.wait (%p691_p1), [#allocation6], 64  }
  0x23   : > { %604 = vsyncadd (%p691_p1), [#allocation6], 4294967232  ;;  %v634_v0 = vmov 2   ;;  %v635_v1 = vmov 1   ;;  %v200_v2 = vld [vmem:[#allocation5] sm:$0xf] }
  0x24   : > { %482 = vset.pattern.permute.xlu1 %v634_v0  ;;  %481 = vset.pattern.permute.xlu0 %v635_v1  ;;  %v234_v3 = vld [vmem:[%s173_s3] sm:$0xf]  ;;  %s636_s24 = smov 1   ;;  %s637_s19 = smov 114   ;;  %v638_v5 = vmov 0   ;;  %vm239_vm0 = vcmask 7168  }
  0x25   : > { %219 = vperm.xlu1 %482, %v200_v2   ;;  %209 = vperm.xlu0 %481, %v200_v2   ;;  %v253_v4 = vld [vmem:[%s173_s3] sm:$0xf]  ;;  %s639_s17 = smov 126   ;;  %s640_s29 = smov 127   ;;  %vm258_vm1 = vcmask 15360   ;;  %vm232_vm2 = vcmask 117768  }
  0x26   : > { %236 = vrot.lane.b32.xlu2 %v234_v3, %s636_s24  ;;  %v201_v6 = vld [vmem:[%s173_s3] sm:$0xf]  ;;  %s641_s4 = smov 15   ;;  %vm251_vm3 = vcmask 3072   ;;  %s199_s5 = scalar_lea.vmem [#allocation7], %s393_s26  ;;  %vm274_vm4 = vcmask 126072  }
  0x27   : > { %s397_s7 = sshll.u32 %s623_s12, 2  ;;  %s290_s21 = sshll.u32 %s199_s5, 4  ;;  %s291_s21 = int_to_ptr.vmem [resolvable:$true] %s290_s21 }
  0x28   : > { %s288_s16 = scalar_lea.hbm %s814_s2, %s397_s7  ;;  %s277_s18 = scalar_lea.sflag [#allocation4], %s756_s25 }
  0x29   : > { %s292_s22 = sshll.u32 %s288_s16, 4  ;;  %s565_s3 = scalar_lea.hbm %s814_s2, 8  ;;  %s293_s22 = int_to_ptr.hbm [resolvable:$true] %s292_s22 }
  0x2a   : > { %s559_s23 = sshra.s32 %s293_s22, 4  ;;  %s560_s23 = int_to_ptr.hbm [resolvable:$true] %s559_s23 }
  0x2b   : > { %s561_s28 = scalar_lea.hbm %s560_s23, 4  ;;  %p566_p11 = scmp.lt.s32.totalorder %s560_s23, %s814_s2 }
  0x2c   : > { %p562_p1 = scmp.ne.s32.totalorder %s560_s23, %s561_s28  ;;  %p567_p12 = scmp.lt.s32.totalorder %s565_s3, %s561_s28 }
  0x2d   : > { %255 = vrot.lane.b32.xlu0 %v253_v4, %s637_s19  ;;  %483 = vset.pattern.permute.xlu1 %v638_v5 }
  0x2e   : > { %204 = vperm.xlu1 %483, %v200_v2   ;;  %484 = vset.pattern.permute.xlu0 %v634_v0  ;;  %p563_p4 = pnand %p562_p1, %p736_p5  ;;  %p568_p13 = por %p567_p12, %p566_p11 }
  0x30   : > { %p564_p8 = pneg %p563_p4 }
  0x32   : > { %p569_p0 = pnand %p568_p13, %p564_p8 }
  0x80   : > { %v237_v11 = vpop.permute.xlu2 %236 }
  0x81   : > { %v240_v12 = vsel %vm239_vm0, 0.0, %v237_v11 }
  0x82   : > { %v241_v13 = vmul.f32 %v240_v12, %v200_v2 }
  0x97   : > { %v220_v7 = vpop.permute.xlu1 %219  ;;  %v210_v8 = vpop.permute.xlu0 %209 }
  0x98   : > { %v222_v9 = vmul.f32 %v220_v7, %v201_v6  ;;  %v212_v10 = vmul.f32 %v210_v8, %v201_v6 }
  0x9a   : > { %224 = vrot.lane.b32.xlu0 %v222_v9, %s639_s17  ;;  %214 = vrot.lane.b32.xlu2 %v212_v10, %s640_s29 }
  0x9f   : > { %v256_v14 = vpop.permute.xlu0 %255 }
  0xa0   : > { %v259_v15 = vsel %vm258_vm1, %v256_v14, 0.0  ;;  %v205_v17 = vpop.permute.xlu1 %204 }
  0xa1   : > { %v260_v16 = vmul.f32 %v259_v15, %v200_v2  ;;  %v207_v18 = vmul.f32 %v205_v17, %v201_v6 }
  0xa2   : > { %243 = vrot.lane.b32.xlu0 %v241_v13, %s640_s29 }
  0xa3   : > { %266 = vrot.lane.b32.xlu2 %v260_v16, %s639_s17  ;;  %262 = vrot.lane.b32.xlu1 %v260_v16, %s640_s29 }
  0xab   : > { %247 = vrot.lane.b32.xlu1 %v241_v13, %s639_s17 }
  0xf4   : > { %v215_v19 = vpop.permute.xlu2 %214 }
  0xf5   : > { %v217_v20 = vadd.f32 %v215_v19, %v207_v18 }
  0xfd   : > { %v267_v25 = vpop.permute.xlu2 %266 }
 0x10c   : > { %v225_v21 = vpop.permute.xlu0 %224 }
 0x10d   : > { %v227_v22 = vadd.f32 %v225_v21, %v217_v20 }
 0x10f   : > { %229 = vrot.lane.b32.xlu2 %v227_v22, %s636_s24 }
 0x114   : > { %v244_v27 = vpop.permute.xlu0 %243 }
 0x115   : > { %v263_v23 = vpop.permute.xlu1 %262  ;;  %v246_v29 = vadd.f32 %v244_v27, %v241_v13 }
 0x116   : > { %v265_v24 = vadd.f32 %v263_v23, %v260_v16 }
 0x118   : > { %v269_v26 = vadd.f32 %v267_v25, %v265_v24 }
 0x11a   : > { %271 = vrot.lane.b32.xlu0 %v269_v26, %s641_s4 }
 0x11d   : > { %v248_v28 = vpop.permute.xlu1 %247 }
 0x11e   : > { %v250_v30 = vadd.f32 %v248_v28, %v246_v29 }
 0x169   : > { %v230_v31 = vpop.permute.xlu2 %229 }
 0x16a   : > { %233 = vst.msk [vmem:[%s199_s5] sm:$0xf] %vm232_vm2, %v230_v31 }
 0x16b   : > { %252 = vst.msk [vmem:[%s199_s5] sm:$0xf] %vm251_vm3, %v250_v30 }
 0x18c   : > { %v272_v32 = vpop.permute.xlu0 %271 }
 0x18d   : > { %275 = vst.msk [vmem:[%s199_s5] sm:$0xf] %vm274_vm4, %v272_v32 }
 0x18e   : > { %572 = shalt.err (!%p569_p0)
}
 0x18f   : > { %406 = dma.vmem_to_hbm [thread:$0]  (%p736_p5), %s291_s21, 64, %s293_s22, %s277_s18  }
 0x190 PF: > { %s304_s25 = sand.u32 1, %s611_s9   ;;  %p417_p3 = pnand %p389_p9, %p706_p6 }
 0x191   : > { %s305_s17 = scalar_lea.sflag [#allocation4], %s304_s25 }
 0x192   : > { %p418_p7 = pneg %p417_p3 }
 0x194   : > { %606 = dma.done.wait (%p418_p7), %s305_s17, 64  }
 0x195   : > { %608 = vsyncadd (%p418_p7), %s305_s17, 4294967232  ;;  %s19_s14 = sadd.s32 1, %s631_s14   ;;  %s822_s9 = smov %s615_s10 }
 0x196   : > { %p16_p10 = scmp.ge.s32.totalorder %s19_s14, 4   ;;  %s823_s10 = smov %s619_s11 }
 0x197   : > { %s824_s11 = smov %s745_s6  ;;  %s825_s12 = smov %s627_s13 }
 0x198   : > { %s826_s13 = smov %s828_s27  ;;  %18 = sbr.rel (!%p16_p10) target bundleno = 7 (0x7), region = 78 }
 0x19d   :  { %311 = vsyncpa [#allocation3], 1 }
 0x19e   :  { %313 = vsyncpa [#allocation3 + $0x1], 1 }
 0x19f   :  { %314 = vsyncpa [#allocation6], 1 }
 0x1a0   :  { %315 = vsyncpa [#allocation4], 1 }
 0x1a1   :  { %317 = vsyncpa [#allocation4 + $0x1], 1 }

</bundles_post_ra>
